<compile_context>
chip_gen: v7x
topology: tpu7x:2x2x1
jax: 0.10.0
libtpu: 0.0.40
codegen_flags: <defaults>
</compile_context>

<pallas_src>
import functools

import jax
import jax.numpy as jnp
from jax.experimental import pallas as pl
from jax.experimental.pallas import tpu as pltpu


def _conv_kernel(x_ref, w_ref, b_ref, o_ref, *, kern, pad):
    """One tile of TB (b,c)-rows.

    x_ref: [TB, N, F_work]  bf16  (time on lanes)
    w_ref: [K, P, N]        bf16  (w_ref[k] == weight[:, :, 0, k])
    b_ref: [P, 1]           f32
    o_ref: [TB, P, F_out]   f32
    """
    x = x_ref[...].astype(jnp.float32)          # roll/mask in f32 (v5e-safe)
    tb, n, fw = x.shape
    p, f_out = o_ref.shape[1], o_ref.shape[2]

    # Lane-index iota built once as (1,1,Fw); compares broadcast over (TB,N,Fw).
    f_idx = jax.lax.broadcasted_iota(jnp.int32, (1, 1, fw), 2)

    acc = jnp.zeros((tb, p, f_out), jnp.float32)
    for k in range(kern):                        # K is small & static -> unrolled
        shift = pad - k                          # tap reads x[..., f + k - pad]
        rolled = pltpu.roll(x, shift=shift % fw, axis=2) if (shift % fw) else x
        if shift > 0:        # only the left edge can run out of range
            tap = jnp.where(f_idx >= shift, rolled, 0.0)
        elif shift < 0:      # only the right edge can run out of range
            tap = jnp.where(f_idx < fw + shift, rolled, 0.0)
        else:                # centre tap: mask is all-true, skip the select
            tap = rolled
        if f_out != fw:
            tap = tap[:, :, :f_out]              # offset-0 (aligned) lane slice
        tap = tap.astype(jnp.bfloat16)           # bf16 MXU operands, f32 accumulate
        wk = jnp.broadcast_to(w_ref[k][None], (tb, p, n))          # [TB, P, N]
        acc = acc + jax.lax.dot_general(
            wk, tap,
            dimension_numbers=(((2,), (1,)), ((0,), (0,))),
            preferred_element_type=jnp.float32)                    # [TB, P, F_out]

    o_ref[...] = (acc + b_ref[...][None, :, :]).astype(o_ref.dtype)


def _pool_kernel(s_ref, st_ref, adj_ref, o_ref):
    # s_ref: [P, N], st_ref: [N, P], adj_ref: [1, N, N], o_ref: [1, P, P]
    # Pure 2-D MXU matmuls per graph; grid axis over G handles batching.
    a = adj_ref[0]                                                   # [N, N]
    sa = jnp.dot(s_ref[...], a, preferred_element_type=jnp.float32) # [P, N]
    o_ref[0] = jnp.dot(sa, st_ref[...],
                       preferred_element_type=jnp.float32).astype(o_ref.dtype)


def _pick_row_tile(bc, bytes_per_row, budget_bytes, min_steps=4):
    """Largest row tile that fits the VMEM budget while keeping >= min_steps
    grid steps (>= 2 per v7x core) so DMA is actually double-buffered."""
    cap = max(1, int(budget_bytes) // max(int(bytes_per_row), 1))
    tb = min(bc, cap)
    if bc >= min_steps:
        tb = min(tb, -(-bc // min_steps))        # ceil(bc / min_steps)
    if tb > 8:
        tb -= tb % 8                             # sublane-aligned tiles
    return max(1, tb)


def dense_time_diff_pool2d(x, adj, weight, bias, re_param, padding):
    """x: [B, C, N, F], adj: [G, N, N], weight: [P, N, 1, K], bias: [P], re_param: [K, 1]."""
    B, C, N, F = x.shape
    P, _, _, K = weight.shape
    G = adj.shape[0]
    F_out = F + 2 * padding - K + 1
    BC = B * C

    # ---- layout prep: free reshapes / tiny tensors only (no HBM transposes of x) ----
    x_k = x.reshape(BC, N, F)                                    # [BC, N, F]
    F_work = max(F, F_out)
    if F_work > F:
        # only when padding > (K-1)//2: zero-extend the time axis so the
        # in-kernel validity mask (src < F_work) stays correct.
        x_k = jnp.pad(x_k, ((0, 0), (0, 0), (0, F_work - F)))
    x_k = x_k.astype(jnp.bfloat16)                               # halve HBM traffic
    w_kpn = jnp.transpose(weight[:, :, 0, :], (2, 0, 1)).astype(jnp.bfloat16)  # [K, P, N]
    b2 = bias.reshape(P, 1).astype(jnp.float32)
    s = jnp.einsum('pnk,k->pn', weight[:, :, 0, :], re_param[:, 0])  # [P, N] hoisted
    s_t = jnp.transpose(s)                                           # [N, P]

    # ---- VMEM budget & row-tile size ----
    try:
        vmem_cap = int(getattr(pltpu.get_tpu_info(), "vmem_capacity_bytes", 0))
    except Exception:
        vmem_cap = 0
    if vmem_cap <= 0:
        vmem_cap = 64 * 1024 * 1024                              # v7x floor
    # ~48 MiB on v7x (64 MiB physical), ~96 MiB on v5e/v6e (128 MiB physical).
    vmem_limit = min((vmem_cap * 3) // 4, 100 * 1024 * 1024)

    # Per-row VMEM bytes for the per-tap kernel (conservative):
    #   bf16 input tile, double-buffered       : 4  * N * F_work
    #   f32 upcast + roll/mask temporaries     : 12 * N * F_work
    #   bf16 sliced tap                        : 2  * N * F_out
    #   bf16 per-tap weight broadcast (<=K)    : 2  * K * P * N
    #   f32 accumulator + dot partials         : 8  * P * F_out
    #   f32 output tile, double-buffered       : 8  * P * F_out
    bytes_per_row = (16 * N * F_work + 2 * N * F_out
                     + 2 * K * P * N + 16 * P * F_out)
    fixed_bytes = 4 * K * P * N + 8 * P                          # dbuf'd weights + bias
    budget = max(bytes_per_row, int(vmem_limit * 0.85) - fixed_bytes)
    TB = _pick_row_tile(BC, bytes_per_row, budget)

    steps = -(-BC // TB)                                         # pl.cdiv
    BC_pad = steps * TB
    if BC_pad != BC:                                             # awkward/prime BC: pad rows
        x_k = jnp.pad(x_k, ((0, BC_pad - BC), (0, 0), (0, 0)))

    conv_out = pl.pallas_call(
        functools.partial(_conv_kernel, kern=K, pad=padding),
        out_shape=jax.ShapeDtypeStruct((BC_pad, P, F_out), jnp.float32),
        grid=(steps,),
        in_specs=[
            pl.BlockSpec((TB, N, F_work), lambda i: (i, 0, 0)),
            pl.BlockSpec((K, P, N), lambda i: (0, 0, 0)),
            pl.BlockSpec((P, 1), lambda i: (0, 0)),
        ],
        out_specs=pl.BlockSpec((TB, P, F_out), lambda i: (i, 0, 0)),
        compiler_params=pltpu.CompilerParams(
            dimension_semantics=("parallel",),
            vmem_limit_bytes=int(vmem_limit)),
    )(x_k, w_kpn, b2)

    out = conv_out[:BC].reshape(B, C, P, F_out)   # free reshape; already [B, C, P, F_out]

    # ---- adj pooling: grid over graphs, 2-D matmuls per graph ----
    out_adj = pl.pallas_call(
        _pool_kernel,
        out_shape=jax.ShapeDtypeStruct((G, P, P), jnp.float32),
        grid=(G,),
        in_specs=[
            pl.BlockSpec((P, N), lambda g: (0, 0)),
            pl.BlockSpec((N, P), lambda g: (0, 0)),
            pl.BlockSpec((1, N, N), lambda g: (g, 0, 0)),
        ],
        out_specs=pl.BlockSpec((1, P, P), lambda g: (g, 0, 0)),
        compiler_params=pltpu.CompilerParams(
            dimension_semantics=("parallel",)),
    )(s, s_t, adj)

    return out, out_adj


def _reference(x, adj, weight, bias, re_param, padding):
    """Pure-JAX reference mirroring the PyTorch forward (f32, highest precision)."""
    B, C, N, F = x.shape
    P, _, _, K = weight.shape
    F_out = F + 2 * padding - K + 1
    hp = jax.lax.Precision.HIGHEST
    xpad = jnp.pad(x, ((0, 0), (0, 0), (0, 0), (padding, padding)))
    out = jnp.zeros((B, C, P, F_out), jnp.float32)
    for k in range(K):
        out = out + jnp.einsum('bcnf,pn->bcpf', xpad[..., k:k + F_out],
                               weight[:, :, 0, k], precision=hp)
    out = out + bias[None, None, :, None]
    s = jnp.einsum('pnk,k->pn', weight[:, :, 0, :], re_param[:, 0])
    out_adj = jnp.einsum('pm,gmn,qn->gpq', s, adj, s, precision=hp)
    return out, out_adj


if __name__ == "__main__":
    # small shapes consistent with the module
    B, C = 2, 4
    pre_nodes, pooled_nodes = 8, 4     # N, P
    F, kern_size, padding = 16, 3, 1   # time axis / conv kernel
    G = 2                              # number of graphs in adj

    key = jax.random.PRNGKey(0)
    k1, k2, k3, k4, k5 = jax.random.split(key, 5)

    fan_in = pre_nodes * kern_size
    weight = jax.random.uniform(k1, (pooled_nodes, pre_nodes, 1, kern_size),
                                jnp.float32, -1.0, 1.0) / jnp.sqrt(float(fan_in))
    bias = jax.random.uniform(k2, (pooled_nodes,), jnp.float32, -0.1, 0.1)
    re_param = jax.random.uniform(k3, (kern_size, 1), jnp.float32, -1.0, 1.0)

    x = jax.random.normal(k4, (B, C, pre_nodes, F), jnp.float32)
    adj = jax.random.normal(k5, (G, pre_nodes, pre_nodes), jnp.float32)

    # Pre-quantize x / weight to bf16-representable f32 so the bf16 kernel I/O
    # and the f32 reference see identical values (keeps the check tight).
    x = x.astype(jnp.bfloat16).astype(jnp.float32)
    weight = weight.astype(jnp.bfloat16).astype(jnp.float32)

    out, out_adj = dense_time_diff_pool2d(x, adj, weight, bias, re_param, padding)
    out = jax.block_until_ready(out)
    out_adj = jax.block_until_ready(out_adj)

    ref_out, ref_adj = _reference(x, adj, weight, bias, re_param, padding)
    assert out.shape == (B, C, pooled_nodes, F)            # same padding -> F_out == F
    assert out_adj.shape == (G, pooled_nodes, pooled_nodes)
    assert jnp.allclose(out, ref_out, atol=2e-3, rtol=2e-3), \
        float(jnp.max(jnp.abs(out - ref_out)))
    assert jnp.allclose(out_adj, ref_adj, atol=2e-3, rtol=2e-3), \
        float(jnp.max(jnp.abs(out_adj - ref_adj)))

    print("KERNEL_OK")
</pallas_src>

<mosaic_0001>
module attributes {stable_mosaic.version = 11 : i64} {
  func.func @_conv_kernel(%arg0: i32, %arg1: memref<2x8x16xbf16, #tpu.memory_space<vmem>>, %arg2: memref<3x4x8xbf16, #tpu.memory_space<vmem>>, %arg3: memref<4x1xf32, #tpu.memory_space<vmem>>, %arg4: memref<2x4x16xf32, #tpu.memory_space<vmem>>) attributes {dimension_semantics = [#tpu.dimension_semantics<parallel>], iteration_bounds = array<i64: 4>, scalar_prefetch = 0 : i64, scratch_operands = 0 : i64, tpu.core_type = #tpu.core_type<tc>, window_params = [{transform_indices = @transform_0, window_bounds = array<i64: 2, 8, 16>}, {pipeline_mode = #tpu.pipeline_mode<synchronous>, transform_indices = @transform_1, window_bounds = array<i64: 3, 4, 8>}, {pipeline_mode = #tpu.pipeline_mode<synchronous>, transform_indices = @transform_2, window_bounds = array<i64: 4, 1>}, {transform_indices = @transform_3, window_bounds = array<i64: 2, 4, 16>}]} {
    %c0 = arith.constant 0 : index
    %c0_0 = arith.constant 0 : index
    %c0_1 = arith.constant 0 : index
    %0 = vector.load %arg1[%c0, %c0_0, %c0_1] : memref<2x8x16xbf16, #tpu.memory_space<vmem>>, vector<2x8x16xbf16>
    %1 = arith.extf %0 : vector<2x8x16xbf16> to vector<2x8x16xf32>
    %2 = tpu.iota {dimensions = array<i32: 2>} : vector<1x1x16xi32>
    %cst = arith.constant 0.000000e+00 : f32
    %3 = vector.broadcast %cst : f32 to vector<2x4x16xf32>
    %c1_i32 = arith.constant 1 : i32
    %4 = tpu.dynamic_rotate %1 by %c1_i32 dim 2 : vector<2x8x16xf32>, i32 -> vector<2x8x16xf32>
    %c1_i32_2 = arith.constant 1 : i32
    %5 = vector.broadcast %c1_i32_2 : i32 to vector<1x1x16xi32>
    %6 = arith.cmpi sge, %2, %5 : vector<1x1x16xi32>
    %cst_3 = arith.constant 0.000000e+00 : f32
    %7 = vector.shape_cast %6 : vector<1x1x16xi1> to vector<1x1x16xi1>
    %8 = vector.broadcast %7 : vector<1x1x16xi1> to vector<2x8x16xi1>
    %9 = vector.broadcast %cst_3 : f32 to vector<2x8x16xf32>
    %10 = arith.select %8, %4, %9 : vector<2x8x16xi1>, vector<2x8x16xf32>
    %11 = arith.truncf %10 : vector<2x8x16xf32> to vector<2x8x16xbf16>
    %c0_4 = arith.constant 0 : index
    %c0_5 = arith.constant 0 : index
    %c0_6 = arith.constant 0 : index
    %12 = vector.load %arg2[%c0_4, %c0_5, %c0_6] : memref<3x4x8xbf16, #tpu.memory_space<vmem>>, vector<1x4x8xbf16>
    %13 = vector.shape_cast %12 : vector<1x4x8xbf16> to vector<4x8xbf16>
    %14 = vector.shape_cast %13 : vector<4x8xbf16> to vector<1x4x8xbf16>
    %15 = vector.shape_cast %14 : vector<1x4x8xbf16> to vector<1x4x8xbf16>
    %16 = vector.broadcast %15 : vector<1x4x8xbf16> to vector<2x4x8xbf16>
    %cst_7 = arith.constant dense<0.000000e+00> : vector<2x4x16xf32>
    %17 = tpu.matmul %16, %11, %cst_7 {dimension_numbers = #tpu.dot_dimension_numbers<[2], [1], [1], [2], [0, 0, 0, 1, 1, 2], [0], [0]>} : vector<2x4x8xbf16>, vector<2x8x16xbf16>, vector<2x4x16xf32> -> vector<2x4x16xf32>
    %18 = arith.addf %3, %17 : vector<2x4x16xf32>
    %19 = arith.truncf %1 : vector<2x8x16xf32> to vector<2x8x16xbf16>
    %c1 = arith.constant 1 : index
    %c0_8 = arith.constant 0 : index
    %c0_9 = arith.constant 0 : index
    %20 = vector.load %arg2[%c1, %c0_8, %c0_9] : memref<3x4x8xbf16, #tpu.memory_space<vmem>>, vector<1x4x8xbf16>
    %21 = vector.shape_cast %20 : vector<1x4x8xbf16> to vector<4x8xbf16>
    %22 = vector.shape_cast %21 : vector<4x8xbf16> to vector<1x4x8xbf16>
    %23 = vector.shape_cast %22 : vector<1x4x8xbf16> to vector<1x4x8xbf16>
    %24 = vector.broadcast %23 : vector<1x4x8xbf16> to vector<2x4x8xbf16>
    %cst_10 = arith.constant dense<0.000000e+00> : vector<2x4x16xf32>
    %25 = tpu.matmul %24, %19, %cst_10 {dimension_numbers = #tpu.dot_dimension_numbers<[2], [1], [1], [2], [0, 0, 0, 1, 1, 2], [0], [0]>} : vector<2x4x8xbf16>, vector<2x8x16xbf16>, vector<2x4x16xf32> -> vector<2x4x16xf32>
    %26 = arith.addf %18, %25 : vector<2x4x16xf32>
    %c15_i32 = arith.constant 15 : i32
    %27 = tpu.dynamic_rotate %1 by %c15_i32 dim 2 : vector<2x8x16xf32>, i32 -> vector<2x8x16xf32>
    %c15_i32_11 = arith.constant 15 : i32
    %28 = vector.broadcast %c15_i32_11 : i32 to vector<1x1x16xi32>
    %29 = arith.cmpi slt, %2, %28 : vector<1x1x16xi32>
    %cst_12 = arith.constant 0.000000e+00 : f32
    %30 = vector.shape_cast %29 : vector<1x1x16xi1> to vector<1x1x16xi1>
    %31 = vector.broadcast %30 : vector<1x1x16xi1> to vector<2x8x16xi1>
    %32 = vector.broadcast %cst_12 : f32 to vector<2x8x16xf32>
    %33 = arith.select %31, %27, %32 : vector<2x8x16xi1>, vector<2x8x16xf32>
    %34 = arith.truncf %33 : vector<2x8x16xf32> to vector<2x8x16xbf16>
    %c2 = arith.constant 2 : index
    %c0_13 = arith.constant 0 : index
    %c0_14 = arith.constant 0 : index
    %35 = vector.load %arg2[%c2, %c0_13, %c0_14] : memref<3x4x8xbf16, #tpu.memory_space<vmem>>, vector<1x4x8xbf16>
    %36 = vector.shape_cast %35 : vector<1x4x8xbf16> to vector<4x8xbf16>
    %37 = vector.shape_cast %36 : vector<4x8xbf16> to vector<1x4x8xbf16>
    %38 = vector.shape_cast %37 : vector<1x4x8xbf16> to vector<1x4x8xbf16>
    %39 = vector.broadcast %38 : vector<1x4x8xbf16> to vector<2x4x8xbf16>
    %cst_15 = arith.constant dense<0.000000e+00> : vector<2x4x16xf32>
    %40 = tpu.matmul %39, %34, %cst_15 {dimension_numbers = #tpu.dot_dimension_numbers<[2], [1], [1], [2], [0, 0, 0, 1, 1, 2], [0], [0]>} : vector<2x4x8xbf16>, vector<2x8x16xbf16>, vector<2x4x16xf32> -> vector<2x4x16xf32>
    %41 = arith.addf %26, %40 : vector<2x4x16xf32>
    %c0_16 = arith.constant 0 : index
    %c0_17 = arith.constant 0 : index
    %42 = vector.load %arg3[%c0_16, %c0_17] : memref<4x1xf32, #tpu.memory_space<vmem>>, vector<4x1xf32>
    %43 = vector.shape_cast %42 : vector<4x1xf32> to vector<1x4x1xf32>
    %44 = vector.broadcast %43 : vector<1x4x1xf32> to vector<2x4x16xf32>
    %45 = arith.addf %41, %44 : vector<2x4x16xf32>
    %c0_18 = arith.constant 0 : index
    %c0_19 = arith.constant 0 : index
    %c0_20 = arith.constant 0 : index
    %46 = vector.load %arg4[%c0_18, %c0_19, %c0_20] : memref<2x4x16xf32, #tpu.memory_space<vmem>>, vector<2x4x16xf32>
    tpu.vector_store %arg4[%c0_18, %c0_19, %c0_20], %45 {strides = array<i32>} : memref<2x4x16xf32, #tpu.memory_space<vmem>>, vector<2x4x16xf32>,
    return
  }
  func.func @transform_0(%arg0: i32) -> (i32, i32, i32) {
    %c0_i32 = arith.constant 0 : i32
    %c0_i32_0 = arith.constant 0 : i32
    %c0_i32_1 = arith.constant 0 : i32
    return %arg0, %c0_i32, %c0_i32_0 : i32, i32, i32
  }
  func.func @transform_1(%arg0: i32) -> (i32, i32, i32) {
    %c0_i32 = arith.constant 0 : i32
    %c0_i32_0 = arith.constant 0 : i32
    %c0_i32_1 = arith.constant 0 : i32
    %c0_i32_2 = arith.constant 0 : i32
    return %c0_i32, %c0_i32_0, %c0_i32_1 : i32, i32, i32
  }
  func.func @transform_2(%arg0: i32) -> (i32, i32) {
    %c0_i32 = arith.constant 0 : i32
    %c0_i32_0 = arith.constant 0 : i32
    %c0_i32_1 = arith.constant 0 : i32
    return %c0_i32, %c0_i32_0 : i32, i32
  }
  func.func @transform_3(%arg0: i32) -> (i32, i32, i32) {
    %c0_i32 = arith.constant 0 : i32
    %c0_i32_0 = arith.constant 0 : i32
    %c0_i32_1 = arith.constant 0 : i32
    return %arg0, %c0_i32, %c0_i32_0 : i32, i32, i32
  }
}

</mosaic_0001>

<bundles_post_ra>
// kernel: tpu_custom_call.1
= control target key start
LH: loop header
LB: loop body
LE: loop exit
PB: predicated region body
PF: predicated region fallthrough
CT: control target
= control target key end

     0   :  { %8 = vsyncpa [#allocation3], 0  ;;  %s1102_s0 = inlined_call_operand.hbm [shape: bf16[8,8,16], index: 0, kind: input, shape index: {}]   ;;  %s1103_s1 = inlined_call_operand.vmem [shape: bf16[3,4,8], index: 1, kind: input, shape index: {}]   ;;  %s1104_s2 = inlined_call_operand.vmem [shape: f32[4,1], index: 2, kind: input, shape index: {}]   ;;  %s1105_s3 = inlined_call_operand.hbm [shape: f32[8,4,16], index: 3, kind: output, shape index: {}]  }
   0x1   :  { %10 = vsyncpa [#allocation3 + $0x1], 0 }
   0x2   :  { %11 = vsyncpa [#allocation4], 0 }
   0x3   :  { %13 = vsyncpa [#allocation4 + $0x1], 0  ;;  %s892_s12 = smov 0   ;;  %s894_s13 = smov 0  }
   0x4   :  { %s896_s14 = smov 0   ;;  %s898_s15 = smov 0  }
   0x5 LB: > { %s913_s16 = sadd.s32 4294967295, %s858_s15   ;;  %s613_s17 = sadd.s32 4294967294, %s858_s15   ;;  %s858_s15 = sphi %s898_s15, %s1117_s15   ;;  %s854_s14 = sphi %s896_s14, %s1116_s14   ;;  %s850_s13 = sphi %s894_s13, %s1115_s13   ;;  %s846_s12 = sphi %s892_s12, %s1114_s12  }
   0x6   : > { %s917_s18 = sadd.s32 1, %s858_s15   ;;  %s26_s19 = sadd.s32 1, %s854_s14 }
   0x7   : > { %s23_s20 = ssub.s32 %s858_s15, %s917_s18  ;;  %p33_p0 = scmp.ne.s32.totalorder %s854_s14, %s850_s13 }
   0x8   : > { %p24_p1 = scmp.eq.s32.totalorder %s23_s20, 0  ;;  %p34_p2 = scmp.eq.s32.totalorder %s858_s15, 0 }
   0x9   : > { %p39_p3 = scmp.ne.s32.totalorder %s850_s13, %s846_s12  ;;  %p40_p4 = scmp.eq.s32.totalorder %s913_s16, 0 }
   0xa   : > { %s929_s21 = scalar_select %p24_p1, %s854_s14, %s26_s19  }
   0xb   : > { %p931_p5 = por %p34_p2, %p33_p0  ;;  %p935_p6 = por %p40_p4, %p39_p3 }
   0xc   : > { %p105_p7 = scmp.eq.s32.totalorder %s913_s16, 3  ;;  %p111_p8 = scmp.eq.s32.totalorder %s613_s17, 3 }
   0xd   : > { %p697_p9 = scmp.lt.s32.totalorder %s858_s15, 4  ;;  %s137_s26 = sand.u32 1, %s854_s14  }
   0xe   : > { %p941_p10 = por %p105_p7, %p33_p0  ;;  %p945_p11 = por %p111_p8, %p39_p3 }
   0xf   : > { %s635_s27 = sshll.u32 %s858_s15, 7  ;;  %s616_s28 = sshll.u32 %s137_s26, 3 }
  0x10   : > { %s1109_s24 = scalar_select %p941_p10, 1, 0 }
  0x11   : > { %s1110_s25 = scalar_select %p945_p11, 1, 0 }
  0x12   : > { %s954_s4 = scalar_lea.hbm %s1102_s0, %s635_s27  ;;  %s141_s5 = scalar_lea.vmem [#allocation2], %s616_s28 }
  0x13   : > { %s148_s6 = sshll.u32 %s141_s5, 4  ;;  %p958_p12 = pnand %p697_p9, %p931_p5  ;;  %s962_s6 = int_to_ptr.vmem [resolvable:$true] %s148_s6 }
  0x14   : > { %s964_s8 = scalar_lea.sflag [#allocation3], %s137_s26  ;;  %s762_s9 = scalar_lea.hbm %s954_s4, 128 }
  0x15   : > { %p763_p13 = scmp.ne.s32.totalorder %s954_s4, %s762_s9  ;;  %p764_p0 = pneg %p958_p12 }
  0x16   : > { %s767_s17 = scalar_lea.hbm %s1102_s0, 512  ;;  %p768_p3 = scmp.lt.u32.totalorder %s954_s4, %s1102_s0 }
  0x17   : > { %p765_p1 = pnand %p764_p0, %p763_p13  ;;  %p769_p4 = scmp.lt.u32.totalorder %s767_s17, %s762_s9 }
  0x18   : > { %p771_p7 = scmp.lt.u32.totalorder %s762_s9, %s954_s4 }
  0x19   : > { %p766_p2 = pneg %p765_p1  ;;  %p770_p5 = por %p769_p4, %p768_p3 }
  0x1b   : > { %p772_p8 = por %p771_p7, %p770_p5 }
  0x1d   : > { %p773_p9 = pnand %p772_p8, %p766_p2 }
  0x1f   : > { %776 = shalt.err (!%p773_p9)
}
  0x20   : > { %s777_s22 = scalar_lea.vmem %s962_s6, 128  ;;  %s860_s26 = smov [#allocation2]  }
  0x21   : > { %p778_p13 = scmp.ne.s32.totalorder %s962_s6, %s777_s22  ;;  %s782_s27 = sshll.u32 %s860_s26, 4  ;;  %s783_s27 = int_to_ptr.vmem [resolvable:$false] %s782_s27 }
  0x22   : > { %s784_s28 = scalar_lea.vmem %s783_s27, 256  ;;  %p785_p10 = scmp.lt.s32.totalorder %s962_s6, %s783_s27 }
  0x23   : > { %p780_p1 = pnand %p778_p13, %p764_p0  ;;  %p786_p3 = scmp.lt.s32.totalorder %s784_s28, %s777_s22 }
  0x25   : > { %p781_p11 = pneg %p780_p1  ;;  %p787_p4 = por %p786_p3, %p785_p10 }
  0x27   : > { %p788_p5 = pnand %p787_p4, %p781_p11 }
  0x29   : > { %791 = shalt.err (!%p788_p5)
}
  0x2a   : > { %s861_s29 = smov 64   ;;  %s862_s30 = smov 4  }
  0x2b   : > { %692 = dma.hbm_to_vmem [thread:$0]  (!%p958_p12), %s954_s4, 128, %s962_s6, %s964_s8, %s861_s29, %s861_s29, %s862_s30  }
  0x2c   : > { %p619_p0 = scmp.ge.s32.totalorder %s858_s15, 1  ;;  %p156_p2 = scmp.lt.s32.totalorder %s858_s15, 5 }
  0x2e   : > { %p157_p7 = pnand %p619_p0, %p156_p2 }
  0x2f   : > { %s995_s5 = sand.u32 (!%p157_p7), 1, %s850_s13  }
  0x30   : > { %160 = sbr.rel (%p157_p7) target bundleno = 664 (0x298), region = 32  ;;  %s620_s9 = sshll.u32 (!%p157_p7), %s995_s5, 3 }
  0x31   : > { %s163_s10 = scalar_lea.sflag (!%p157_p7), [#allocation3], %s995_s5  ;;  %s166_s11 = scalar_lea.vmem (!%p157_p7), [#allocation2], %s620_s9 }
  0x37   : > { %837 = dma.done.wait (%p935_p6), %s163_s10, 128  }
  0x38   : > { %839 = vsyncadd (%p935_p6), %s163_s10, 4294967168  ;;  %v192_v0 = vld [vmem:[%s166_s11] sm:$0xf]  ;;  %v193_v1 = vld [vmem:[%s166_s11 + $0x4] sm:$0xf]  ;;  %s863_s4 = smov 16   ;;  %v196_v23 = vlaneseq }
  0x39   : > { %v194_v2 = vunpack.c.l.bf16 %v192_v0  ;;  %v195_v3 = vunpack.c.l.bf16 %v193_v1  ;;  %vm198_vm0 = vcmask 1047680   ;;  %vm233_vm1 = vcmask 1043456   ;;  %v622_v14 = vld [vmem:[%s1103_s1 + $0x2] sm:$0x3]  ;;  %s866_s7 = smov 113   ;;  %s867_s8 = smov 127  }
  0x3a   : > { %v864_v10 = vmov 0.0   ;;  %v235_v11 = vsel %vm233_vm1, %v192_v0, 0  ;;  %v278_v12 = vsel %vm233_vm1, %v193_v1, 0  ;;  %vm865_vm2 = vmmov 0   ;;  %v515_v21 = vld [vmem:[%s1104_s2] sm:$0xf] }
  0x3b   : > { %v741_v4 = vpack.i.bf16 %v195_v3, %v194_v2  ;;  %649 = vmatprep.subr.bf16.mxu0 %v864_v10  ;;  %655 = vmatprep.subr.bf16.mxu1 %v864_v10  ;;  %vm229_vm3 = vcmask 64512   ;;  %v868_v22 = vmov 0   ;;  %v197_v24 = vand.u32 127, %v196_v23  ;;  %v226_v39 = vld [vmem:[%s1103_s1] sm:$0x3]  ;;  %s188_s28 = scalar_lea.vmem [#allocation5], %s620_s9 }
  0x3c   : > { %650 = vmatpush3.bf16.msra.mxu0 %v235_v11  ;;  %656 = vmatpush3.bf16.msra.mxu1 %v278_v12  ;;  %v627_v44 = vld [vmem:[%s1103_s1 + $0x4] sm:$0x3]  ;;  %s540_s29 = sshll.u32 %s188_s28, 4  ;;  %s636_s30 = sshll.u32 %s913_s16, 7  ;;  %vm523_vm6 = vcmask 125952   ;;  %s1054_s29 = int_to_ptr.vmem [resolvable:$true] %s540_s29 }
  0x3d   : > { %742 = vrot.lane.b32.xlu0 %v741_v4, %s863_s4  ;;  %661 = vmatprep.subr.bf16.mxu0 %v864_v10  ;;  %vm211_vm4 = vcmp.ge.s32.totalorder %v197_v24, 1  ;;  %vm409_vm5 = vcmp.lt.s32.totalorder %v197_v24, 15  ;;  %s1059_s11 = scalar_lea.hbm %s1105_s3, %s636_s30  ;;  %s527_s16 = scalar_lea.sflag [#allocation4], %s995_s5 }
  0x3e   : > { %667 = vmatprep.subr.bf16.mxu1 %v864_v10  ;;  %651 = vmatprep.mubr.msk.bf16.mxu0 %vm865_vm2, %v864_v10  ;;  %p1112_p10 = scmp.ne.s32.totalorder %s1109_s24, 0  ;;  %s869_s23 = smov [#allocation5]  }
  0x3f   : > { %657 = vmatprep.mubr.msk.bf16.mxu1 %vm865_vm2, %v864_v10  ;;  %652 = vmatmul.mubr.msk.bf16.vlgmr.msra.gmra.mrb[0].mxu0 %vm229_vm3, %v622_v14  ;;  %s796_s6 = sshll.u32 %s869_s23, 4  ;;  %s797_s6 = int_to_ptr.vmem [resolvable:$false] %s796_s6 }
  0x40   : > { %658 = vmatmul.mubr.msk.bf16.vlgmr.msra.gmra.mrb[0].mxu1 %vm229_vm3, %v622_v14  ;;  %663 = vmatprep.mubr.msk.bf16.mxu0 %vm865_vm2, %v864_v10  ;;  %p799_p8 = scmp.lt.s32.totalorder %s1054_s29, %s797_s6 }
  0x41   : > { %669 = vmatprep.mubr.msk.bf16.mxu1 %vm865_vm2, %v864_v10  ;;  %761 = vset.pattern.permute.xlu0 %v868_v22 }
  0xaf   : > { %v743_v5 = vpop.permute.xlu0 %742 }
  0xb0   : > { %v745_v6 = vunpack.i.h.bf16 %v743_v5  ;;  %v744_v7 = vunpack.i.l.bf16 %v743_v5 }
  0xb2   : > { %v201_v8 = vsel %vm198_vm0, %v744_v7, %v194_v2  ;;  %v204_v9 = vsel %vm198_vm0, %v745_v6, %v195_v3 }
  0xb3   : > { %v746_v13 = vpack.i.bf16 %v204_v9, %v201_v8 }
  0xb5   : > { %747 = vrot.lane.b32.xlu0 %v746_v13, %s863_s4  ;;  %s792_s4 = scalar_lea.vmem %s1054_s29, 128 }
  0xb6   : > { %p793_p6 = scmp.ne.s32.totalorder %s1054_s29, %s792_s4 }
  0xb8   : > { %p794_p11 = pnand %p793_p6, %p1112_p10 }
  0xb9   : > { %518 = vperm.xlu0 %761, %v515_v21  }
  0xba   : > { %p795_p12 = pneg %p794_p11 }
 0x112   : > { %v271_v45 = vpop.f32.mrb[0].mxu0 }
 0x113   : > { %v314_v46 = vpop.f32.mrb[0].mxu1  ;;  %v653_v47 = vpop.f32.mrb[1].mxu0 }
 0x114   : > { %v659_v48 = vpop.f32.mrb[1].mxu1  ;;  %v274_v49 = vpop.f32.mrb[2].mxu0 }
 0x115   : > { %v317_v50 = vpop.f32.mrb[2].mxu1  ;;  %v654_v51 = vpop.f32.mrb[3].mxu0 }
 0x116   : > { %v660_v52 = vpop.f32.mrb[3].mxu1 }
 0x127   : > { %v748_v15 = vpop.permute.xlu0 %747 }
 0x128   : > { %v750_v16 = vunpack.i.h.bf16 %v748_v15  ;;  %v749_v17 = vunpack.i.l.bf16 %v748_v15 }
 0x12a   : > { %v209_v18 = vsel %vm198_vm0, %v749_v17, %v194_v2  ;;  %v210_v19 = vsel %vm198_vm0, %v750_v16, %v195_v3 }
 0x12b   : > { %v751_v20 = vpack.i.bf16 %v210_v19, %v209_v18 }
 0x12d   : > { %752 = vrot.lane.b32.xlu1 %v751_v20, %s866_s7  ;;  %s798_s7 = scalar_lea.vmem %s797_s6, 256 }
 0x12e   : > { %p800_p9 = scmp.lt.s32.totalorder %s798_s7, %s792_s4 }
 0x130   : > { %p801_p13 = por %p800_p9, %p799_p8 }
 0x131   : > { %757 = vrot.lane.b32.xlu1 %v751_v20, %s867_s8 }
 0x132   : > { %p802_p1 = pnand %p801_p13, %p795_p12 }
 0x138   : > { %v519_v63 = vpop.permute.xlu0 %518 }
 0x19f   : > { %v753_v25 = vpop.permute.xlu1 %752 }
 0x1a0   : > { %v755_v26 = vunpack.i.h.bf16 %v753_v25  ;;  %v754_v27 = vunpack.i.l.bf16 %v753_v25 }
 0x1a2   : > { %v223_v28 = vsel %vm211_vm4, %v755_v26, 0.0  ;;  %v222_v29 = vsel %vm211_vm4, %v754_v27, 0.0 }
 0x1a3   : > { %v225_v30 = vpack.c.bf16 %v223_v28, %v223_v28  ;;  %v224_v31 = vpack.c.bf16 %v222_v29, %v222_v29  ;;  %v758_v32 = vpop.permute.xlu1 %757 }
 0x1a4   : > { %v760_v33 = vunpack.i.h.bf16 %v758_v32  ;;  %v759_v34 = vunpack.i.l.bf16 %v758_v32 }
 0x1a5   : > { %v324_v35 = vsel %vm233_vm1, %v224_v31, 0  ;;  %v367_v36 = vsel %vm233_vm1, %v225_v30, 0 }
 0x1a6   : > { %v419_v37 = vsel %vm409_vm5, %v760_v33, 0.0  ;;  %v418_v38 = vsel %vm409_vm5, %v759_v34, 0.0  ;;  %662 = vmatpush3.bf16.msra.mxu0 %v324_v35  ;;  %668 = vmatpush3.bf16.msra.mxu1 %v367_v36 }
 0x1a7   : > { %v421_v40 = vpack.c.bf16 %v419_v37, %v419_v37  ;;  %v420_v41 = vpack.c.bf16 %v418_v38, %v418_v38  ;;  %673 = vmatprep.subr.bf16.mxu0 %v864_v10  ;;  %679 = vmatprep.subr.bf16.mxu1 %v864_v10 }
 0x1a9   : > { %664 = vmatmul.mubr.msk.bf16.vlgmr.msra.gmra.mrb[4].mxu0 %vm229_vm3, %v226_v39  ;;  %670 = vmatmul.mubr.msk.bf16.vlgmr.msra.gmra.mrb[4].mxu1 %vm229_vm3, %v226_v39  ;;  %v428_v42 = vsel %vm233_vm1, %v420_v41, 0  ;;  %v471_v43 = vsel %vm233_vm1, %v421_v40, 0 }
 0x1aa   : > { %674 = vmatpush3.bf16.msra.mxu0 %v428_v42  ;;  %680 = vmatpush3.bf16.msra.mxu1 %v471_v43 }
 0x1ab   : > { %675 = vmatprep.mubr.msk.bf16.mxu0 %vm865_vm2, %v864_v10  ;;  %681 = vmatprep.mubr.msk.bf16.mxu1 %vm865_vm2, %v864_v10 }
 0x1b1   : > { %676 = vmatmul.mubr.msk.bf16.vlgmr.msra.gmra.mrb[8].mxu0 %vm229_vm3, %v627_v44  ;;  %682 = vmatmul.mubr.msk.bf16.vlgmr.msra.gmra.mrb[8].mxu1 %vm229_vm3, %v627_v44 }
 0x27c   : > { %v360_v53 = vpop.f32.mrb[4].mxu0  ;;  %v403_v54 = vpop.f32.mrb[4].mxu1 }
 0x27d   : > { %v361_v55 = vadd.f32 %v360_v53, %v271_v45  ;;  %v404_v56 = vadd.f32 %v403_v54, %v314_v46  ;;  %v665_v57 = vpop.f32.mrb[5].mxu0  ;;  %v671_v58 = vpop.f32.mrb[5].mxu1 }
 0x27e   : > { %v363_v59 = vpop.f32.mrb[6].mxu0  ;;  %v406_v60 = vpop.f32.mrb[6].mxu1 }
 0x27f   : > { %v666_v61 = vpop.f32.mrb[7].mxu0  ;;  %v672_v62 = vpop.f32.mrb[7].mxu1 }
 0x284   : > { %v464_v0 = vpop.f32.mrb[8].mxu0  ;;  %v507_v1 = vpop.f32.mrb[8].mxu1 }
 0x285   : > { %v513_v2 = vadd.f32 %v464_v0, %v361_v55  ;;  %v514_v3 = vadd.f32 %v507_v1, %v404_v56  ;;  %v677_v4 = vpop.f32.mrb[9].mxu0  ;;  %v683_v5 = vpop.f32.mrb[9].mxu1 }
 0x286   : > { %v467_v6 = vpop.f32.mrb[10].mxu0  ;;  %v510_v7 = vpop.f32.mrb[10].mxu1 }
 0x287   : > { %v521_v8 = vadd.f32 %v519_v63, %v513_v2  ;;  %v522_v9 = vadd.f32 %v519_v63, %v514_v3  ;;  %v678_v10 = vpop.f32.mrb[11].mxu0  ;;  %v684_v11 = vpop.f32.mrb[11].mxu1 }
 0x289   : > { %524 = vst.msk [vmem:[%s188_s28] sm:$0xf] %vm523_vm6, %v521_v8  ;;  %525 = vst.msk [vmem:[%s188_s28 + $0x4] sm:$0xf] %vm523_vm6, %v522_v9 }
 0x28a   : > { %805 = shalt.err (!%p802_p1)
}
 0x28b   : > { %s806_s8 = scalar_lea.hbm %s1059_s11, 128  ;;  %s810_s20 = scalar_lea.hbm %s1105_s3, 512 }
 0x28c   : > { %p807_p3 = scmp.ne.s32.totalorder %s1059_s11, %s806_s8  ;;  %p811_p0 = scmp.lt.u32.totalorder %s1059_s11, %s1105_s3 }
 0x28d   : > { %p812_p2 = scmp.lt.u32.totalorder %s810_s20, %s806_s8  ;;  %p814_p6 = scmp.lt.u32.totalorder %s806_s8, %s1059_s11 }
 0x28e   : > { %p808_p4 = pnand %p807_p3, %p1112_p10 }
 0x28f   : > { %p813_p7 = por %p812_p2, %p811_p0 }
 0x290   : > { %p809_p5 = pneg %p808_p4 }
 0x291   : > { %p815_p11 = por %p814_p6, %p813_p7 }
 0x293   : > { %p816_p12 = pnand %p815_p11, %p809_p5 }
 0x295   : > { %819 = shalt.err (!%p816_p12)
}
 0x296   : > { %s870_s27 = smov 64   ;;  %s871_s28 = smov 4  }
 0x297   : > { %687 = dma.vmem_to_hbm [thread:$0]  (%p1112_p10), %s1054_s29, 128, %s1059_s11, %s527_s16, %s870_s27, %s870_s27, %s871_s28  }
 0x298 PF: > { %p698_p8 = scmp.ge.s32.totalorder %s858_s15, 2  ;;  %s555_s30 = sand.u32 1, %s846_s12  }
 0x299   : > { %p1113_p9 = scmp.ne.s32.totalorder %s1110_s25, 0  ;;  %s556_s10 = scalar_lea.sflag [#allocation4], %s555_s30 }
 0x29b   : > { %p694_p13 = pnand %p698_p8, %p1113_p9 }
 0x29d   : > { %841 = dma.done.wait (!%p694_p13), %s556_s10, 128  }
 0x29e   : > { %843 = vsyncadd (!%p694_p13), %s556_s10, 4294967168  ;;  %p16_p1 = scmp.ge.s32.totalorder %s917_s18, 6   ;;  %s1114_s12 = smov %s850_s13 }
 0x29f   : > { %s1115_s13 = smov %s854_s14  ;;  %s1116_s14 = smov %s929_s21 }
 0x2a0   : > { %s1117_s15 = smov %s917_s18  ;;  %18 = sbr.rel (!%p16_p1) target bundleno = 5 (0x5), region = 79 }
 0x2a7   :  { %561 = vsyncpa [#allocation3], 1 }
 0x2a8   :  { %563 = vsyncpa [#allocation3 + $0x1], 1 }
 0x2a9   :  { %564 = vsyncpa [#allocation4], 1 }
 0x2aa   :  { %566 = vsyncpa [#allocation4 + $0x1], 1 }

</bundles_post_ra>
